<compile_context>
chip_gen: v7x
topology: tpu7x:2x2x1
jax: 0.10.0
libtpu: 0.0.40
codegen_flags: <defaults>
</compile_context>

<pallas_src>
import math

import jax
import jax.numpy as jnp
from jax.experimental import pallas as pl
from jax.experimental.pallas import tpu as pltpu

NUM_CLASSES = 5      # timm head num_classes and LastModule input/output width
HIDDEN = 32          # synthetic backbone logical feature width
D_PAD = 128          # lane-dense (zero-padded) feature width streamed by the kernel
MAX_TK = 4096        # upper bound on the K (reduction) tile


def feat_matmul_kernel(x_ref, w_ref, feat_ref):
    """Accumulate x_tile @ w_tile into the resident (B, 128) f32 output block.

    grid = (D_PAD // 128 [parallel], K_i // TK [arbitrary, reduction]).
    x_ref: (B, TK) bf16, w_ref: (TK, 128) bf16, feat_ref: (B, 128) f32.
    """
    k = pl.program_id(1)

    @pl.when(k == 0)
    def _init():
        feat_ref[...] = jnp.zeros_like(feat_ref)

    feat_ref[...] += jnp.dot(x_ref[...], w_ref[...],
                             preferred_element_type=jnp.float32)


def _feat_partial(x_flat, w_feat, k_start, tk):
    """One pallas_call contracting x_flat (B, K_i) against w_feat[k_start:k_start+K_i].

    The weight stream is read directly from the shared (K_total, D_PAD) w_feat via a
    block-offset index_map — no weight slicing and no activation concat in HBM.
    """
    B, K_i = x_flat.shape
    K_total, D = w_feat.shape
    assert K_i % tk == 0 and k_start % tk == 0
    k_off_blocks = k_start // tk
    dn = 128
    assert D % dn == 0
    grid = (D // dn, K_i // tk)   # ("parallel", "arbitrary"): v7x can shard axis 0

    return pl.pallas_call(
        feat_matmul_kernel,
        out_shape=jax.ShapeDtypeStruct((B, D), jnp.float32),
        grid_spec=pltpu.PrefetchScalarGridSpec(
            num_scalar_prefetch=0,
            grid=grid,
            in_specs=[
                pl.BlockSpec((B, tk), lambda j, k: (0, k)),          # activation tile
                pl.BlockSpec((tk, dn),                                # weight tile
                             lambda j, k, off=k_off_blocks: (k + off, j)),
            ],
            out_specs=pl.BlockSpec((B, dn), lambda j, k: (0, j)),     # resident acc
        ),
        compiler_params=pltpu.CompilerParams(
            dimension_semantics=("parallel", "arbitrary"),
            vmem_limit_bytes=32 * 1024 * 1024),                       # > v5e 16MiB default
    )(x_flat, w_feat)


def _choose_tk(k_sizes, max_tk=MAX_TK):
    """Largest common K tile that divides every per-input K and is a multiple of 128."""
    g = 0
    for k in k_sizes:
        g = math.gcd(g, int(k))
    best = None
    for d in range(1, int(math.isqrt(g)) + 1):
        if g % d == 0:
            for c in (d, g // d):
                if c % 128 == 0 and c <= max_tk and (best is None or c > best):
                    best = c
    return best


def _epilogue(feat, w_head, b_head, w_fc0, w_fc1):
    """Tiny head: GELU -> (32,5) classifier -> LastModule fc0/ReLU/fc1 (bias-free)."""
    d_logical = w_head.shape[0]
    feat = jax.nn.gelu(feat[:, :d_logical], approximate=True)
    logits = feat @ w_head + b_head          # backbone classifier -> 5 logits
    h = jnp.maximum(logits @ w_fc0, 0.0)     # LastModule fc0 (5->10, no bias) + ReLU
    return h @ w_fc1                         # LastModule fc1 (10->5, no bias)


def coatnet_forward(inputs, params):
    """inputs: list of NCHW arrays, conceptually concatenated along channels (dim=1)."""
    w_feat, w_head, b_head, w_fc0, w_fc1 = params
    B = inputs[0].shape[0]
    K_total, D = w_feat.shape

    # Flatten each contiguous NCHW input to (B, C_i*H*W) (free reshape) and stream it
    # in bf16.  Contracting each piece against its K-range of w_feat reproduces
    # concat(dim=1)+flatten exactly, without the extra HBM round trip of the concat.
    xs = [jnp.reshape(x, (B, -1)).astype(jnp.bfloat16) for x in inputs]
    k_sizes = [int(x.shape[1]) for x in xs]
    assert sum(k_sizes) == K_total, "param K must match total flattened input size"

    tk = _choose_tk(k_sizes)
    if tk is None:
        # Fallback for ragged per-input sizes: materialize the concat and use one
        # full-K block (legal via the "equals full dim" escape hatch).
        # TODO(synk): pad K to a multiple of 128 instead for large ragged inputs.
        xs = [jnp.concatenate(xs, axis=1)]
        k_sizes = [K_total]
        tk = K_total

    partials = []
    k_start = 0
    for x_i, k_i in zip(xs, k_sizes):
        partials.append(_feat_partial(x_i, w_feat, k_start, tk))
        k_start += k_i
    feat = partials[0]
    for p in partials[1:]:
        feat = feat + p                      # (B, 128) f32, trivially cheap

    return _epilogue(feat, w_head, b_head, w_fc0, w_fc1)


def make_params(key, k_in, d=HIDDEN, d_pad=D_PAD):
    """Deterministic synthetic parameters (no checkpoint load).

    Linear weights are stored transposed w.r.t. PyTorch (in, out) so x @ W is computed
    directly.  w_feat is zero-padded from d=32 to 128 columns (lane-dense weight tile)
    and stored in bf16 to halve the dominant HBM stream."""
    k1, k2, k3, k4, k5 = jax.random.split(key, 5)
    w_feat = jax.random.normal(k1, (k_in, d), jnp.float32) * 0.02
    w_feat = jnp.pad(w_feat, ((0, 0), (0, d_pad - d))).astype(jnp.bfloat16)
    w_head = jax.random.normal(k2, (d, NUM_CLASSES), jnp.float32) * 0.1
    b_head = jax.random.normal(k3, (1, NUM_CLASSES), jnp.float32) * 0.1
    w_fc0 = jax.random.normal(k4, (NUM_CLASSES, 2 * NUM_CLASSES), jnp.float32) * 0.3
    w_fc1 = jax.random.normal(k5, (2 * NUM_CLASSES, NUM_CLASSES), jnp.float32) * 0.3
    return (w_feat, w_head, b_head, w_fc0, w_fc1)


def reference_forward(inputs, params):
    """Pure-JAX reference mirroring the module semantics (for a sanity check)."""
    w_feat, w_head, b_head, w_fc0, w_fc1 = params
    x = jnp.concatenate(inputs, axis=1)                  # torch.concat([...], dim=1)
    B = x.shape[0]
    x_flat = x.reshape(B, -1).astype(jnp.bfloat16)
    feat = jnp.dot(x_flat, w_feat, preferred_element_type=jnp.float32)
    return _epilogue(feat, w_head, b_head, w_fc0, w_fc1)


if __name__ == "__main__":
    key = jax.random.PRNGKey(0)
    k_a, k_b, k_p = jax.random.split(key, 3)

    # Two NCHW inputs concatenated along channels: (2,2,16,16) x2 -> (2,4,16,16)
    B, C_each, H, W = 2, 2, 16, 16
    inp0 = jax.random.normal(k_a, (B, C_each, H, W), jnp.float32)
    inp1 = jax.random.normal(k_b, (B, C_each, H, W), jnp.float32)
    inputs = [inp0, inp1]

    k_in = 2 * C_each * H * W            # flattened C*H*W after channel concat = 1024
    params = make_params(k_p, k_in)

    out = coatnet_forward(inputs, params)
    out = jax.block_until_ready(out)

    ref = reference_forward(inputs, params)
    assert out.shape == (B, NUM_CLASSES)
    assert jnp.allclose(out, ref, atol=1e-3, rtol=1e-3), "mismatch vs JAX reference"

    print("KERNEL_OK")
</pallas_src>

<mosaic_0001>
module attributes {stable_mosaic.version = 11 : i64} {
  func.func @feat_matmul_kernel(%arg0: i32, %arg1: i32, %arg2: memref<2x512xbf16, #tpu.memory_space<vmem>>, %arg3: memref<512x128xbf16, #tpu.memory_space<vmem>>, %arg4: memref<2x128xf32, #tpu.memory_space<vmem>>) attributes {dimension_semantics = [#tpu.dimension_semantics<parallel>, #tpu.dimension_semantics<arbitrary>], iteration_bounds = array<i64: 1, 1>, scalar_prefetch = 0 : i64, scratch_operands = 0 : i64, tpu.core_type = #tpu.core_type<tc>, window_params = [{transform_indices = @transform_0, window_bounds = array<i64: 2, 512>}, {transform_indices = @transform_1, window_bounds = array<i64: 512, 128>}, {transform_indices = @transform_2, window_bounds = array<i64: 2, 128>}]} {
    %c0_i32 = arith.constant 0 : i32
    %0 = arith.cmpi eq, %arg1, %c0_i32 : i32
    %1 = arith.extui %0 : i1 to i32
    %c0_i32_0 = arith.constant 0 : i32
    %2 = arith.cmpi ne, %1, %c0_i32_0 : i32
    scf.if %2 {
      %cst_8 = arith.constant 0.000000e+00 : f32
      %9 = vector.broadcast %cst_8 : f32 to vector<2x128xf32>
      %c0_9 = arith.constant 0 : index
      %c0_10 = arith.constant 0 : index
      %10 = vector.load %arg4[%c0_9, %c0_10] : memref<2x128xf32, #tpu.memory_space<vmem>>, vector<2x128xf32>
      tpu.vector_store %arg4[%c0_9, %c0_10], %9 {strides = array<i32>} : memref<2x128xf32, #tpu.memory_space<vmem>>, vector<2x128xf32>,
    } else {
    }
    %c0 = arith.constant 0 : index
    %c0_1 = arith.constant 0 : index
    %3 = vector.load %arg4[%c0, %c0_1] : memref<2x128xf32, #tpu.memory_space<vmem>>, vector<2x128xf32>
    %c0_2 = arith.constant 0 : index
    %c0_3 = arith.constant 0 : index
    %4 = vector.load %arg2[%c0_2, %c0_3] : memref<2x512xbf16, #tpu.memory_space<vmem>>, vector<2x512xbf16>
    %c0_4 = arith.constant 0 : index
    %c0_5 = arith.constant 0 : index
    %5 = vector.load %arg3[%c0_4, %c0_5] : memref<512x128xbf16, #tpu.memory_space<vmem>>, vector<512x128xbf16>
    %cst = arith.constant dense<0.000000e+00> : vector<2x128xf32>
    %6 = tpu.matmul %4, %5, %cst {dimension_numbers = #tpu.dot_dimension_numbers<[1], [0], [0], [1], [0, 0, 1, 1], [], []>} : vector<2x512xbf16>, vector<512x128xbf16>, vector<2x128xf32> -> vector<2x128xf32>
    %7 = arith.addf %3, %6 : vector<2x128xf32>
    %c0_6 = arith.constant 0 : index
    %c0_7 = arith.constant 0 : index
    %8 = vector.load %arg4[%c0_6, %c0_7] : memref<2x128xf32, #tpu.memory_space<vmem>>, vector<2x128xf32>
    tpu.vector_store %arg4[%c0_6, %c0_7], %7 {strides = array<i32>} : memref<2x128xf32, #tpu.memory_space<vmem>>, vector<2x128xf32>,
    return
  }
  func.func @transform_0(%arg0: i32, %arg1: i32) -> (i32, i32) {
    %c0_i32 = arith.constant 0 : i32
    %c0_i32_0 = arith.constant 0 : i32
    return %c0_i32, %arg1 : i32, i32
  }
  func.func @transform_1(%arg0: i32, %arg1: i32) -> (i32, i32) {
    %c0_i32 = arith.constant 0 : i32
    %0 = arith.addi %arg1, %c0_i32 : i32
    %c0_i32_0 = arith.constant 0 : i32
    return %0, %arg0 : i32, i32
  }
  func.func @transform_2(%arg0: i32, %arg1: i32) -> (i32, i32) {
    %c0_i32 = arith.constant 0 : i32
    %c0_i32_0 = arith.constant 0 : i32
    return %c0_i32, %arg0 : i32, i32
  }
}

</mosaic_0001>

<bundles_post_ra>
// kernel: tpu_custom_call.1
= control target key start
LH: loop header
LB: loop body
LE: loop exit
PB: predicated region body
PF: predicated region fallthrough
CT: control target
= control target key end

     0   :  { %7 = vsyncpa [#allocation3], 0  ;;  %s685_s0 = inlined_call_operand.hbm [shape: bf16[2,512], index: 0, kind: input, shape index: {}]   ;;  %s686_s1 = inlined_call_operand.hbm [shape: bf16[1024,128], index: 1, kind: input, shape index: {}]   ;;  %s687_s2 = inlined_call_operand.hbm [shape: f32[2,128], index: 2, kind: output, shape index: {}]  }
   0x1   :  { %8 = vsyncpa [#allocation6], 0 }
   0x2   :  { %9 = vsyncpa [#allocation4], 0  ;;  %s617_s9 = smov [#allocation2]   ;;  %s618_s11 = smov [#allocation5]  }
   0x3   :  { %s16_s10 = sshll.u32 %s617_s9, 4  ;;  %s25_s12 = sshll.u32 %s618_s11, 4  ;;  %s17_s10 = int_to_ptr.vmem [resolvable:$true] %s16_s10  ;;  %s639_s12 = int_to_ptr.vmem [resolvable:$true] %s25_s12 }
   0x4   :  { %s545_s15 = scalar_lea.hbm %s685_s0, 64 }
   0x5   :  { %p546_p0 = scmp.ne.s32.totalorder %s685_s0, %s545_s15  ;;  %p549_p1 = scmp.lt.u32.totalorder %s545_s15, %s685_s0 }
   0x7   :  { %p551_p2 = pnand %p549_p1, %p546_p0 }
   0x9   :  { %554 = shalt.err (!%p551_p2)
}
   0xa   :  { %s555_s20 = scalar_lea.vmem %s17_s10, 64  ;;  %p560_p4 = scmp.lt.s32.totalorder %s17_s10, %s17_s10 }
   0xb   :  { %p556_p3 = scmp.ne.s32.totalorder %s17_s10, %s555_s20  ;;  %p561_p5 = scmp.lt.s32.totalorder %s555_s20, %s555_s20 }
   0xd   :  { %p562_p6 = por %p561_p5, %p560_p4 }
   0xf   :  { %p563_p7 = pnand %p562_p6, %p556_p3 }
  0x11   :  { %566 = shalt.err (!%p563_p7)
}
  0x12   :  { %19 = dma.hbm_to_vmem [thread:$0]  %s685_s0, 64, %s17_s10, [#allocation3]  }
  0x13   :  { %s567_s25 = scalar_lea.hbm %s686_s1, 4096  ;;  %s569_s30 = scalar_lea.hbm %s686_s1, 8192 }
  0x14   :  { %p568_p8 = scmp.ne.s32.totalorder %s686_s1, %s567_s25  ;;  %p570_p9 = scmp.lt.u32.totalorder %s569_s30, %s567_s25 }
  0x15   :  { %p571_p10 = scmp.lt.u32.totalorder %s567_s25, %s686_s1 }
  0x17   :  { %p572_p11 = por %p571_p10, %p570_p9 }
  0x19   :  { %p573_p12 = pnand %p572_p11, %p568_p8 }
  0x1b   :  { %576 = shalt.err (!%p573_p12)
}
  0x1c   :  { %s577_s0 = scalar_lea.vmem %s639_s12, 4096  ;;  %p582_p0 = scmp.lt.s32.totalorder %s639_s12, %s639_s12 }
  0x1d   :  { %p578_p13 = scmp.ne.s32.totalorder %s639_s12, %s577_s0  ;;  %p583_p1 = scmp.lt.s32.totalorder %s577_s0, %s577_s0 }
  0x1f   :  { %p584_p2 = por %p583_p1, %p582_p0 }
  0x21   :  { %p585_p3 = pnand %p584_p2, %p578_p13 }
  0x23   :  { %588 = shalt.err (!%p585_p3)
}
  0x24   :  { %s619_s5 = smov 64   ;;  %s620_s6 = smov 4  }
  0x25   :  { %31 = dma.hbm_to_vmem [thread:$0]  %s686_s1, 4096, %s639_s12, [#allocation6], %s619_s5, %s619_s5, %s620_s6  }
  0x26   :  { %611 = dma.done.wait [#allocation3], 64  }
  0x27   :  { %612 = vsyncadd [#allocation3], 4294967232 }
  0x28   :  { %613 = dma.done.wait [#allocation6], 4096  }
  0x29   :  { %614 = vsyncadd [#allocation6], 4294963200  ;;  %v513_v0 = vld [vmem:[#allocation5 + $0x40] sm:$0xff]   ;;  %v517_v4 = vld [vmem:[#allocation5 + $0x48] sm:$0xff]   ;;  %v621_v22 = vmov 1966171168   ;;  %v122_v24 = vlaneseq }
  0x2a   :  { %v514_v1 = vld [vmem:[#allocation5 + $0xc0] sm:$0xff]   ;;  %462 = vmatprep.subr.bf16.mxu0 %v513_v0  ;;  %v518_v5 = vld [vmem:[#allocation5 + $0xc8] sm:$0xff]   ;;  %v521_v8 = vld [vmem:[#allocation5 + $0x50] sm:$0xff]   ;;  %v120_v23 = vunpack.c.l.s4 %v621_v22  ;;  %v622_v44 = vmov 0.0   ;;  %s623_s1 = smov [#allocation7]  }
  0x2b   :  { %v515_v2 = vld [vmem:[#allocation5] sm:$0xff]   ;;  %484 = vmatprep.subr.bf16.mxu1 %v514_v1  ;;  %v519_v6 = vld [vmem:[#allocation5 + $0x8] sm:$0xff]   ;;  %v522_v9 = vld [vmem:[#allocation5 + $0xd0] sm:$0xff]   ;;  %v123_v30 = vshrl.u32 %v122_v24, 7  ;;  %43 = vst [vmem:[#allocation7] sm:$0x3] %v622_v44 }
  0x2c   :  { %v516_v3 = vld [vmem:[#allocation5 + $0x80] sm:$0xff]   ;;  %463 = vmatpush3.bf16.msra.mxu0 %v515_v2  ;;  %v520_v7 = vld [vmem:[#allocation5 + $0x88] sm:$0xff]   ;;  %v523_v10 = vld [vmem:[#allocation5 + $0x10] sm:$0xff]   ;;  %v121_v29 = vunpack.c.0.s8 %v120_v23  ;;  %s419_s9 = sshll.u32 %s623_s1, 4  ;;  %s420_s9 = int_to_ptr.vmem [resolvable:$true] %s419_s9 }
  0x2d   :  { %485 = vmatpush3.bf16.msra.mxu1 %v516_v3  ;;  %464 = vmatprep.subr.bf16.mxu0 %v517_v4  ;;  %v524_v11 = vld [vmem:[#allocation5 + $0x90] sm:$0xff]   ;;  %v525_v12 = vld [vmem:[#allocation5 + $0x58] sm:$0xff]   ;;  %v529_v16 = vld [vmem:[#allocation5 + $0x60] sm:$0xff]   ;;  %s589_s10 = scalar_lea.vmem %s420_s9, 32  ;;  %p594_p5 = scmp.lt.s32.totalorder %s420_s9, %s420_s9 }
  0x2e   :  { %486 = vmatprep.subr.bf16.mxu1 %v518_v5  ;;  %v526_v13 = vld [vmem:[#allocation5 + $0xd8] sm:$0xff]   ;;  %v530_v17 = vld [vmem:[#allocation5 + $0xe0] sm:$0xff]   ;;  %v533_v20 = vld [vmem:[#allocation5 + $0x68] sm:$0xff]   ;;  %v124_v35 = vsub.s32 %v121_v29, %v123_v30  ;;  %p590_p4 = scmp.ne.s32.totalorder %s420_s9, %s589_s10  ;;  %p595_p6 = scmp.lt.s32.totalorder %s589_s10, %s589_s10 }
  0x2f   :  { %v527_v14 = vld [vmem:[#allocation5 + $0x18] sm:$0xff]   ;;  %v531_v18 = vld [vmem:[#allocation5 + $0x20] sm:$0xff]   ;;  %v534_v21 = vld [vmem:[#allocation5 + $0xe8] sm:$0xff]  }
  0x30   :  { %465 = vmatpush3.bf16.msra.mxu0 %v519_v6  ;;  %v528_v15 = vld [vmem:[#allocation5 + $0x98] sm:$0xff]   ;;  %v532_v19 = vld [vmem:[#allocation5 + $0xa0] sm:$0xff]   ;;  %v535_v25 = vld [vmem:[#allocation5 + $0x28] sm:$0xff]   ;;  %p596_p7 = por %p595_p6, %p594_p5 }
  0x31   :  { %487 = vmatpush3.bf16.msra.mxu1 %v520_v7  ;;  %466 = vmatprep.subr.bf16.mxu0 %v521_v8  ;;  %v536_v26 = vld [vmem:[#allocation5 + $0xa8] sm:$0xff]   ;;  %v537_v27 = vld [vmem:[#allocation5 + $0x70] sm:$0xff]   ;;  %v541_v33 = vld [vmem:[#allocation5 + $0x78] sm:$0xff]  }
  0x32   :  { %488 = vmatprep.subr.bf16.mxu1 %v522_v9  ;;  %v538_v28 = vld [vmem:[#allocation5 + $0xf0] sm:$0xff]   ;;  %v542_v34 = vld [vmem:[#allocation5 + $0xf8] sm:$0xff]   ;;  %v44_v54 = vld [vmem:[#allocation7] sm:$0x3]  ;;  %p597_p8 = pnand %p596_p7, %p590_p4 }
  0x33   :  { %v539_v31 = vld [vmem:[#allocation5 + $0x30] sm:$0xff]   ;;  %v543_v36 = vld [vmem:[#allocation5 + $0x38] sm:$0xff]  }
  0x34   :  { %467 = vmatpush3.bf16.msra.mxu0 %v523_v10  ;;  %v540_v32 = vld [vmem:[#allocation5 + $0xb0] sm:$0xff]   ;;  %v544_v37 = vld [vmem:[#allocation5 + $0xb8] sm:$0xff]  }
  0x35   :  { %489 = vmatpush3.bf16.msra.mxu1 %v524_v11  ;;  %468 = vmatprep.subr.bf16.mxu0 %v525_v12  ;;  %v429_v38 = vld.sshfl [vmem:[#allocation2] sm:$0x33 pattern:$0x75316420] }
  0x36   :  { %490 = vmatprep.subr.bf16.mxu1 %v526_v13  ;;  %v118_v39 = vcombine.high %v429_v38, %v429_v38  ;;  %v125_v40 = vrot.slane %v429_v38, %v124_v35 }
  0x38   :  { %469 = vmatpush3.bf16.msra.mxu0 %v527_v14  ;;  %v132_v41 = vrot.slane %v118_v39, %v124_v35  ;;  %v133_v42 = vcombine.high %v125_v40, %v125_v40 }
  0x39   :  { %491 = vmatpush3.bf16.msra.mxu1 %v528_v15  ;;  %470 = vmatprep.subr.bf16.mxu0 %v529_v16 }
  0x3a   :  { %492 = vmatprep.subr.bf16.mxu1 %v530_v17  ;;  %363 = vmatprep.mubr.bf16.mxu0 %v132_v41  ;;  %v134_v43 = vcombine.high %v132_v41, %v132_v41 }
  0x3c   :  { %471 = vmatpush3.bf16.msra.mxu0 %v531_v18  ;;  %403 = vmatprep.mubr.bf16.mxu1 %v134_v43 }
  0x3d   :  { %493 = vmatpush3.bf16.msra.mxu1 %v532_v19  ;;  %472 = vmatprep.subr.bf16.mxu0 %v533_v20 }
  0x3e   :  { %494 = vmatprep.subr.bf16.mxu1 %v534_v21 }
  0x40   :  { %473 = vmatpush3.bf16.msra.mxu0 %v535_v25 }
  0x41   :  { %495 = vmatpush3.bf16.msra.mxu1 %v536_v26  ;;  %474 = vmatprep.subr.bf16.mxu0 %v537_v27 }
  0x42   :  { %496 = vmatprep.subr.bf16.mxu1 %v538_v28 }
  0x44   :  { %475 = vmatpush3.bf16.msra.mxu0 %v539_v31 }
  0x45   :  { %497 = vmatpush3.bf16.msra.mxu1 %v540_v32  ;;  %476 = vmatprep.subr.bf16.mxu0 %v541_v33 }
  0x46   :  { %498 = vmatprep.subr.bf16.mxu1 %v542_v34 }
  0x48   :  { %477 = vmatpush3.bf16.msra.mxu0 %v543_v36 }
  0x49   :  { %499 = vmatpush3.bf16.msra.mxu1 %v544_v37 }
  0x4b   :  { %364 = vmatmul.mubr.bf16.vlgmr.msra.gmra.mrb[0].mxu0 %v125_v40 }
  0x4c   :  { %404 = vmatmul.mubr.bf16.vlgmr.msra.gmra.mrb[0].mxu1 %v133_v42 }
 0x11e   :  { %v478_v45 = vpop.f32.mrb[0].mxu0 }
 0x11f   :  { %v479_v46 = vpop.f32.mrb[1].mxu0  ;;  %v500_v47 = vpop.f32.mrb[0].mxu1 }
 0x120   :  { %v480_v48 = vadd.f32 %v479_v46, %v478_v45  ;;  %v481_v49 = vpop.f32.mrb[2].mxu0  ;;  %v501_v50 = vpop.f32.mrb[1].mxu1 }
 0x121   :  { %v482_v51 = vpop.f32.mrb[3].mxu0  ;;  %v502_v52 = vadd.f32 %v501_v50, %v500_v47  ;;  %v503_v53 = vpop.f32.mrb[2].mxu1 }
 0x122   :  { %v504_v55 = vpop.f32.mrb[3].mxu1 }
 0x123   :  { %v406_v56 = vadd.f32 %v502_v52, %v480_v48 }
 0x125   :  { %v411_v57 = vadd.f32 %v406_v56, %v44_v54 }
 0x127   :  { %412 = vst [vmem:[#allocation7] sm:$0x3] %v411_v57 }
 0x128   :  { %600 = shalt.err (!%p597_p8)
}
 0x129   :  { %s601_s13 = scalar_lea.hbm %s687_s2, 32 }
 0x12a   :  { %p602_p9 = scmp.ne.s32.totalorder %s687_s2, %s601_s13  ;;  %p605_p10 = scmp.lt.u32.totalorder %s601_s13, %s687_s2 }
 0x12c   :  { %p607_p11 = pnand %p605_p10, %p602_p9 }
 0x12e   :  { %610 = shalt.err (!%p607_p11)
}
 0x12f   :  { %422 = dma.vmem_to_hbm [thread:$0]  %s420_s9, 32, %s687_s2, [#allocation4]  }
 0x130   :  { %615 = dma.done.wait [#allocation4], 32  }
 0x131   :  { %616 = vsyncadd [#allocation4], 4294967264 }
 0x132   :  { %426 = vsyncpa [#allocation3], 1 }
 0x133   :  { %427 = vsyncpa [#allocation6], 1 }
 0x134   :  { %428 = vsyncpa [#allocation4], 1 }

</bundles_post_ra>
